<compile_context>
chip_gen: v7x
topology: tpu7x:2x2x1
jax: 0.10.0
libtpu: 0.0.40
codegen_flags: <defaults>
</compile_context>

<pallas_src>
import math

import jax
import jax.numpy as jnp
from jax.experimental import pallas as pl
from jax.experimental.pallas import tpu as pltpu


_INV_SQRT2 = 1.0 / math.sqrt(2.0)


def _gelu_exact(x):
    # Exact (erf-based) GELU, matching torch.nn.GELU() default.
    return 0.5 * x * (1.0 + jax.lax.erf(x * _INV_SQRT2))


def feedforward_kernel(x_ref, w1_ref, b1_ref, w2_ref, b2_ref, o_ref, acc_ref):
    k = pl.program_id(1)

    @pl.when(k == 0)
    def _():
        acc_ref[...] = jnp.zeros_like(acc_ref)

    # ---- Linear1 hidden block (bf16 MXU, f32 accumulate) + bias + exact GELU ----
    h = jnp.dot(x_ref[...], w1_ref[...], preferred_element_type=jnp.float32)
    h = _gelu_exact(h + b1_ref[...])

    # ---- Linear2 partial product for this hidden block, f32 accumulation ----
    acc_ref[...] += jnp.dot(h.astype(w2_ref.dtype), w2_ref[...],
                            preferred_element_type=jnp.float32)

    @pl.when(k == pl.num_programs(1) - 1)
    def _():
        o_ref[...] = (acc_ref[...] + b2_ref[...]).astype(o_ref.dtype)


def _round_up(a, b):
    return (a + b - 1) // b * b


def _vmem_capacity_bytes():
    try:
        return int(pltpu.get_tpu_info().vmem_capacity_bytes)
    except Exception:
        return 64 << 20  # conservative: v7x per-TC VMEM


def _pick_tk(hidden, dim):
    """Hidden-dim tile: divides hidden, multiple of 128, bounded weight-block VMEM."""
    budget = 16 << 20  # for the two (dim, tk)/(tk, dim) bf16 blocks, double-buffered
    cap = max(128, min(512, budget // max(1, 8 * dim)))
    cap = (cap // 128) * 128
    if hidden <= cap or hidden % 128 != 0:
        return hidden
    for tk in range(cap, 127, -128):
        if hidden % tk == 0:
            return tk
    return hidden


def _pick_tm(m, cap=256):
    """Row tile: multiple of 8, <= cap, and >=2 grid steps when possible (v7x megacore)."""
    if m <= 8:
        return m
    if m <= 2 * cap:
        return min(cap, _round_up(pl.cdiv(m, 2), 8))
    return cap


def _vmem_footprint(tm, tk, dim):
    bf2, f4 = 2, 4
    x_t = 2 * tm * dim * bf2          # x tile, double-buffered, bf16
    o_t = 2 * tm * dim * f4           # out tile, double-buffered, f32
    w1_t = 2 * dim * tk * bf2         # W1 block, double-buffered, bf16
    w2_t = 2 * tk * dim * bf2         # W2 block, double-buffered, bf16
    b1_t = 2 * tk * f4                # b1 block
    b2_t = 2 * dim * f4               # b2 (pinned, still 2 buffers)
    acc = tm * dim * f4               # f32 accumulator scratch
    h = tm * tk * f4                  # f32 intermediate (vregs/VMEM temporaries)
    return x_t + o_t + w1_t + w2_t + b1_t + b2_t + acc + h


def feedforward_forward(x, params):
    """Fused FeedForward forward. x: (..., dim). Leading dims flatten into rows."""
    w1, b1, w2, b2 = params
    dim, hidden = w1.shape
    assert w2.shape == (hidden, dim)

    orig_shape = x.shape
    x2d = x.reshape(-1, dim).astype(jnp.bfloat16)
    m = x2d.shape[0]

    tk = _pick_tk(hidden, dim)
    tm = _pick_tm(m)

    capacity = _vmem_capacity_bytes()
    ceiling = max(16 << 20, capacity - (16 << 20))
    slack = 2 << 20
    while _vmem_footprint(tm, tk, dim) + slack > ceiling and tm > 8:
        tm = max(8, _round_up(tm // 2, 8))
    vmem_limit = int(min(ceiling, max(_vmem_footprint(tm, tk, dim) + slack, 16 << 20)))

    grid_m = pl.cdiv(m, tm)
    grid_k = pl.cdiv(hidden, tk)

    cost = pl.CostEstimate(
        flops=2 * m * dim * hidden * 2,
        transcendentals=m * hidden,
        bytes_accessed=(m * dim * (2 + 4)                         # x (bf16) + y (f32)
                        + grid_m * (2 * dim * hidden * 2          # W1+W2 re-streamed per row tile
                                    + hidden * 4 + dim * 4)),     # biases
    )

    out = pl.pallas_call(
        feedforward_kernel,
        out_shape=jax.ShapeDtypeStruct((m, dim), jnp.float32),
        grid_spec=pltpu.PrefetchScalarGridSpec(
            num_scalar_prefetch=0,
            grid=(grid_m, grid_k),
            in_specs=[
                pl.BlockSpec((tm, dim), lambda i, k: (i, 0)),   # x row tile
                pl.BlockSpec((dim, tk), lambda i, k: (0, k)),   # W1 hidden block (streamed)
                pl.BlockSpec((1, tk), lambda i, k: (0, k)),     # b1 hidden block
                pl.BlockSpec((tk, dim), lambda i, k: (k, 0)),   # W2 hidden block (streamed)
                pl.BlockSpec((1, dim), lambda i, k: (0, 0)),    # b2 (pinned)
            ],
            out_specs=pl.BlockSpec((tm, dim), lambda i, k: (i, 0)),
            scratch_shapes=[pltpu.VMEM((tm, dim), jnp.float32)],
        ),
        compiler_params=pltpu.CompilerParams(
            dimension_semantics=("parallel", "arbitrary"),
            vmem_limit_bytes=vmem_limit,
        ),
        cost_estimate=cost,
    )(x2d, w1, b1, w2, b2)

    return out.reshape(orig_shape)


def init_params(key, dim, hidden_dim):
    """nn.Linear-shaped params; weights stored (in_features, out_features) in bf16."""
    ks = jax.random.split(key, 4)
    w1 = (jax.random.normal(ks[0], (dim, hidden_dim), jnp.float32) * 0.05).astype(jnp.bfloat16)
    b1 = jax.random.normal(ks[1], (1, hidden_dim), jnp.float32) * 0.05
    w2 = (jax.random.normal(ks[2], (hidden_dim, dim), jnp.float32) * 0.05).astype(jnp.bfloat16)
    b2 = jax.random.normal(ks[3], (1, dim), jnp.float32) * 0.05
    return (w1, b1, w2, b2)


def reference_forward(x, params):
    """Pure-JAX reference with the same mixed precision (bf16 operands, f32 accum)."""
    w1, b1, w2, b2 = params
    xb = x.reshape(-1, x.shape[-1]).astype(jnp.bfloat16)
    h = jnp.dot(xb, w1, preferred_element_type=jnp.float32) + b1
    h = _gelu_exact(h)
    y = jnp.dot(h.astype(jnp.bfloat16), w2, preferred_element_type=jnp.float32) + b2
    return y.reshape(x.shape)


if __name__ == "__main__":
    # FeedForward(dim=128, hidden_dim=256, dropout=0.0) — eval-mode forward.
    B, S, DIM, HIDDEN = 2, 8, 128, 256

    key = jax.random.PRNGKey(0)
    kx, kp = jax.random.split(key)
    x = jax.random.normal(kx, (B, S, DIM), jnp.float32)
    params = init_params(kp, DIM, HIDDEN)

    out = jax.block_until_ready(feedforward_forward(x, params))
    ref = reference_forward(x, params)
    assert out.shape == (B, S, DIM)
    assert jnp.allclose(out, ref, atol=2e-2, rtol=2e-2), "mismatch vs reference"

    # Ragged row count (not a multiple of the row tile) to exercise block masking.
    x2 = jax.random.normal(kx, (3, 5, DIM), jnp.float32)
    out2 = jax.block_until_ready(feedforward_forward(x2, params))
    ref2 = reference_forward(x2, params)
    assert out2.shape == (3, 5, DIM)
    assert jnp.allclose(out2, ref2, atol=2e-2, rtol=2e-2), "mismatch vs reference (ragged)"

    # TODO(synk): stochastic Dropout (training mode, p>0) is not implemented;
    # this kernel reproduces eval-mode / dropout=0.0 semantics.
    print("KERNEL_OK")
</pallas_src>

<mosaic_0001>
module attributes {stable_mosaic.version = 11 : i64} {
  func.func @feedforward_kernel(%arg0: i32, %arg1: i32, %arg2: memref<8x128xbf16, #tpu.memory_space<vmem>>, %arg3: memref<128x256xbf16, #tpu.memory_space<vmem>>, %arg4: memref<1x256xf32, #tpu.memory_space<vmem>>, %arg5: memref<256x128xbf16, #tpu.memory_space<vmem>>, %arg6: memref<1x128xf32, #tpu.memory_space<vmem>>, %arg7: memref<8x128xf32, #tpu.memory_space<vmem>>, %arg8: memref<8x128xf32, #tpu.memory_space<vmem>>) attributes {dimension_semantics = [#tpu.dimension_semantics<parallel>, #tpu.dimension_semantics<arbitrary>], iteration_bounds = array<i64: 2, 1>, scalar_prefetch = 0 : i64, scratch_operands = 1 : i64, tpu.core_type = #tpu.core_type<tc>, window_params = [{transform_indices = @transform_0, window_bounds = array<i64: 8, 128>}, {transform_indices = @transform_1, window_bounds = array<i64: 128, 256>}, {transform_indices = @transform_2, window_bounds = array<i64: 1, 256>}, {transform_indices = @transform_3, window_bounds = array<i64: 256, 128>}, {pipeline_mode = #tpu.pipeline_mode<synchronous>, transform_indices = @transform_4, window_bounds = array<i64: 1, 128>}, {transform_indices = @transform_5, window_bounds = array<i64: 8, 128>}]} {
    %c0_i32 = arith.constant 0 : i32
    %0 = arith.cmpi eq, %arg1, %c0_i32 : i32
    %1 = arith.extui %0 : i1 to i32
    %c0_i32_0 = arith.constant 0 : i32
    %2 = arith.cmpi ne, %1, %c0_i32_0 : i32
    scf.if %2 {
      %cst_18 = arith.constant 0.000000e+00 : f32
      %26 = vector.broadcast %cst_18 : f32 to vector<8x128xf32>
      %c0_19 = arith.constant 0 : index
      %c0_20 = arith.constant 0 : index
      %27 = vector.load %arg8[%c0_19, %c0_20] : memref<8x128xf32, #tpu.memory_space<vmem>>, vector<8x128xf32>
      tpu.vector_store %arg8[%c0_19, %c0_20], %26 {strides = array<i32>} : memref<8x128xf32, #tpu.memory_space<vmem>>, vector<8x128xf32>,
    } else {
    }
    %c0 = arith.constant 0 : index
    %c0_1 = arith.constant 0 : index
    %3 = vector.load %arg2[%c0, %c0_1] : memref<8x128xbf16, #tpu.memory_space<vmem>>, vector<8x128xbf16>
    %c0_2 = arith.constant 0 : index
    %c0_3 = arith.constant 0 : index
    %4 = vector.load %arg3[%c0_2, %c0_3] : memref<128x256xbf16, #tpu.memory_space<vmem>>, vector<128x256xbf16>
    %cst = arith.constant dense<0.000000e+00> : vector<8x256xf32>
    %5 = tpu.matmul %3, %4, %cst {dimension_numbers = #tpu.dot_dimension_numbers<[1], [0], [0], [1], [0, 0, 1, 1], [], []>} : vector<8x128xbf16>, vector<128x256xbf16>, vector<8x256xf32> -> vector<8x256xf32>
    %c0_4 = arith.constant 0 : index
    %c0_5 = arith.constant 0 : index
    %6 = vector.load %arg4[%c0_4, %c0_5] : memref<1x256xf32, #tpu.memory_space<vmem>>, vector<1x256xf32>
    %7 = vector.broadcast %6 : vector<1x256xf32> to vector<8x256xf32>
    %8 = arith.addf %5, %7 : vector<8x256xf32>
    %cst_6 = arith.constant 5.000000e-01 : f32
    %9 = vector.broadcast %cst_6 : f32 to vector<8x256xf32>
    %10 = arith.mulf %9, %8 : vector<8x256xf32>
    %cst_7 = arith.constant 0.707106769 : f32
    %11 = vector.broadcast %cst_7 : f32 to vector<8x256xf32>
    %12 = arith.mulf %8, %11 : vector<8x256xf32>
    %13 = math.erf %12 : vector<8x256xf32>
    %cst_8 = arith.constant 1.000000e+00 : f32
    %14 = vector.broadcast %cst_8 : f32 to vector<8x256xf32>
    %15 = arith.addf %14, %13 : vector<8x256xf32>
    %16 = arith.mulf %10, %15 : vector<8x256xf32>
    %c0_9 = arith.constant 0 : index
    %c0_10 = arith.constant 0 : index
    %17 = vector.load %arg8[%c0_9, %c0_10] : memref<8x128xf32, #tpu.memory_space<vmem>>, vector<8x128xf32>
    %18 = arith.truncf %16 : vector<8x256xf32> to vector<8x256xbf16>
    %c0_11 = arith.constant 0 : index
    %c0_12 = arith.constant 0 : index
    %19 = vector.load %arg5[%c0_11, %c0_12] : memref<256x128xbf16, #tpu.memory_space<vmem>>, vector<256x128xbf16>
    %cst_13 = arith.constant dense<0.000000e+00> : vector<8x128xf32>
    %20 = tpu.matmul %18, %19, %cst_13 {dimension_numbers = #tpu.dot_dimension_numbers<[1], [0], [0], [1], [0, 0, 1, 1], [], []>} : vector<8x256xbf16>, vector<256x128xbf16>, vector<8x128xf32> -> vector<8x128xf32>
    %21 = arith.addf %17, %20 : vector<8x128xf32>
    %c0_14 = arith.constant 0 : index
    %c0_15 = arith.constant 0 : index
    %22 = vector.load %arg8[%c0_14, %c0_15] : memref<8x128xf32, #tpu.memory_space<vmem>>, vector<8x128xf32>
    tpu.vector_store %arg8[%c0_14, %c0_15], %21 {strides = array<i32>} : memref<8x128xf32, #tpu.memory_space<vmem>>, vector<8x128xf32>,
    %c0_i32_16 = arith.constant 0 : i32
    %23 = arith.cmpi eq, %arg1, %c0_i32_16 : i32
    %24 = arith.extui %23 : i1 to i32
    %c0_i32_17 = arith.constant 0 : i32
    %25 = arith.cmpi ne, %24, %c0_i32_17 : i32
    scf.if %25 {
      %c0_18 = arith.constant 0 : index
      %c0_19 = arith.constant 0 : index
      %26 = vector.load %arg8[%c0_18, %c0_19] : memref<8x128xf32, #tpu.memory_space<vmem>>, vector<8x128xf32>
      %c0_20 = arith.constant 0 : index
      %c0_21 = arith.constant 0 : index
      %27 = vector.load %arg6[%c0_20, %c0_21] : memref<1x128xf32, #tpu.memory_space<vmem>>, vector<1x128xf32>
      %28 = vector.broadcast %27 : vector<1x128xf32> to vector<8x128xf32>
      %29 = arith.addf %26, %28 : vector<8x128xf32>
      %c0_22 = arith.constant 0 : index
      %c0_23 = arith.constant 0 : index
      %30 = vector.load %arg7[%c0_22, %c0_23] : memref<8x128xf32, #tpu.memory_space<vmem>>, vector<8x128xf32>
      tpu.vector_store %arg7[%c0_22, %c0_23], %29 {strides = array<i32>} : memref<8x128xf32, #tpu.memory_space<vmem>>, vector<8x128xf32>,
    } else {
    }
    return
  }
  func.func @transform_0(%arg0: i32, %arg1: i32) -> (i32, i32) {
    %c0_i32 = arith.constant 0 : i32
    %c0_i32_0 = arith.constant 0 : i32
    return %arg0, %c0_i32 : i32, i32
  }
  func.func @transform_1(%arg0: i32, %arg1: i32) -> (i32, i32) {
    %c0_i32 = arith.constant 0 : i32
    %c0_i32_0 = arith.constant 0 : i32
    return %c0_i32, %arg1 : i32, i32
  }
  func.func @transform_2(%arg0: i32, %arg1: i32) -> (i32, i32) {
    %c0_i32 = arith.constant 0 : i32
    %c0_i32_0 = arith.constant 0 : i32
    return %c0_i32, %arg1 : i32, i32
  }
  func.func @transform_3(%arg0: i32, %arg1: i32) -> (i32, i32) {
    %c0_i32 = arith.constant 0 : i32
    %c0_i32_0 = arith.constant 0 : i32
    return %arg1, %c0_i32 : i32, i32
  }
  func.func @transform_4(%arg0: i32, %arg1: i32) -> (i32, i32) {
    %c0_i32 = arith.constant 0 : i32
    %c0_i32_0 = arith.constant 0 : i32
    %c0_i32_1 = arith.constant 0 : i32
    return %c0_i32, %c0_i32_0 : i32, i32
  }
  func.func @transform_5(%arg0: i32, %arg1: i32) -> (i32, i32) {
    %c0_i32 = arith.constant 0 : i32
    %c0_i32_0 = arith.constant 0 : i32
    return %arg0, %c0_i32 : i32, i32
  }
}

</mosaic_0001>

<bundles_post_ra>
// kernel: tpu_custom_call.1
= control target key start
LH: loop header
LB: loop body
LE: loop exit
PB: predicated region body
PF: predicated region fallthrough
CT: control target
= control target key end

     0   :  { %10 = vsyncpa [#allocation4], 0  ;;  %s1475_s0 = inlined_call_operand.hbm [shape: bf16[16,128], index: 0, kind: input, shape index: {}]   ;;  %s1476_s1 = inlined_call_operand.hbm [shape: bf16[128,256], index: 1, kind: input, shape index: {}]   ;;  %s1477_s2 = inlined_call_operand.vmem [shape: f32[1,256], index: 2, kind: input, shape index: {}]   ;;  %s1478_s3 = inlined_call_operand.hbm [shape: bf16[256,128], index: 3, kind: input, shape index: {}]   ;;  %s1479_s4 = inlined_call_operand.vmem [shape: f32[1,128], index: 4, kind: input, shape index: {}]   ;;  %s1480_s5 = inlined_call_operand.hbm [shape: f32[16,128], index: 5, kind: output, shape index: {}]  }
   0x1   :  { %12 = vsyncpa [#allocation4 + $0x1], 0 }
   0x2   :  { %13 = vsyncpa [#allocation7], 0 }
   0x3   :  { %14 = vsyncpa [#allocation5], 0 }
   0x4   :  { %16 = vsyncpa [#allocation5 + $0x1], 0  ;;  %s1215_s18 = smov 0   ;;  %s1217_s19 = smov 0  }
   0x5   :  { %s1219_s20 = smov 0   ;;  %s1221_s21 = smov 0  }
   0x6   :  { %s1223_s22 = smov 0   ;;  %s1225_s23 = smov 0  }
   0x7 LB: > { %s797_s24 = sadd.s32 4294967295, %s1174_s23   ;;  %s798_s25 = sadd.s32 4294967294, %s1174_s23   ;;  %s1174_s23 = sphi %s1225_s23, %s22_s23   ;;  %s1170_s22 = sphi %s1223_s22, %s1502_s22   ;;  %s1166_s21 = sphi %s1221_s21, %s1501_s21   ;;  %s1162_s20 = sphi %s1219_s20, %s1500_s20   ;;  %s1158_s19 = sphi %s1217_s19, %s1499_s19   ;;  %s1154_s18 = sphi %s1215_s18, %s1498_s18  }
   0x8   : > { %p54_p0 = scmp.ne.s32.totalorder %s1158_s19, %s1154_s18  ;;  %p1249_p1 = scmp.eq.s32.totalorder %s797_s24, 0 }
   0x9   : > { %p1253_p2 = scmp.eq.s32.totalorder %s797_s24, 1  ;;  %p183_p3 = scmp.eq.s32.totalorder %s798_s25, 1 }
   0xa   : > { %s1485_s26 = scalar_select %p1249_p1, 1, 0 }
   0xb   : > { %p1259_p4 = por %p1249_p1, %p54_p0  ;;  %p799_p5 = scmp.ge.s32.totalorder %s1174_s23, 1 }
   0xc   : > { %p1264_p6 = por %p183_p3, %p54_p0  ;;  %p190_p7 = scmp.lt.s32.totalorder %s1174_s23, 3 }
   0xd   : > { %s1487_s28 = scalar_select %p1259_p4, 1, 0 }
   0xe   : > { %s1488_s29 = scalar_select %p1264_p6, 1, 0 }
   0xf   : > { %p1269_p8 = pnand %p799_p5, %p190_p7  ;;  %s1176_s6 = smov [#allocation6]  }
  0x10   : > { %s205_s7 = sshll.u32 %s1176_s6, 4  ;;  %s1177_s9 = smov [#allocation8]   ;;  %s1273_s7 = int_to_ptr.vmem [resolvable:$true] %s205_s7 }
  0x11   : > { %p882_p9 = pneg %p1269_p8  ;;  %s229_s10 = sshll.u32 %s1177_s9, 4  ;;  %s1284_s10 = int_to_ptr.vmem [resolvable:$true] %s229_s10 }
  0x12   : > { %s1002_s13 = scalar_lea.hbm %s1476_s1, 2048 }
  0x13   : > { %p1280_p11 = pnand %p882_p9, %p1249_p1  ;;  %p1003_p12 = scmp.ne.s32.totalorder %s1476_s1, %s1002_s13 }
  0x14   : > { %p1009_p5 = scmp.lt.u32.totalorder %s1002_s13, %s1476_s1 }
  0x15   : > { %p1004_p13 = pneg %p1280_p11 }
  0x17   : > { %p1005_p0 = pnand %p1004_p13, %p1003_p12 }
  0x19   : > { %p1006_p3 = pneg %p1005_p0 }
  0x1b   : > { %p1011_p7 = pnand %p1009_p5, %p1006_p3 }
  0x1d   : > { %1014 = shalt.err (!%p1011_p7)
}
  0x1e   : > { %s1015_s24 = scalar_lea.vmem %s1273_s7, 2048  ;;  %p1023_p1 = scmp.lt.s32.totalorder %s1273_s7, %s1273_s7 }
  0x1f   : > { %p1016_p9 = scmp.ne.s32.totalorder %s1273_s7, %s1015_s24  ;;  %p1024_p12 = scmp.lt.s32.totalorder %s1015_s24, %s1015_s24 }
  0x21   : > { %p1018_p10 = pnand %p1016_p9, %p1004_p13  ;;  %p1025_p0 = por %p1024_p12, %p1023_p1 }
  0x23   : > { %p1019_p6 = pneg %p1018_p10 }
  0x25   : > { %p1026_p4 = pnand %p1025_p0, %p1019_p6 }
  0x27   : > { %1029 = shalt.err (!%p1026_p4)
}
  0x28   : > { %s1178_s25 = smov 128   ;;  %s1179_s6 = smov 8  }
  0x29   : > { %885 = dma.hbm_to_vmem [thread:$0]  (!%p1280_p11), %s1476_s1, 2048, %s1273_s7, [#allocation7], %s1178_s25, %s1178_s25, %s1179_s6  }
  0x2a   : > { %s1030_s14 = scalar_lea.hbm %s1478_s3, 2048 }
  0x2b   : > { %p1031_p1 = scmp.ne.s32.totalorder %s1478_s3, %s1030_s14  ;;  %p1037_p10 = scmp.lt.u32.totalorder %s1030_s14, %s1478_s3 }
  0x2d   : > { %p1033_p4 = pnand %p1031_p1, %p1004_p13 }
  0x2f   : > { %p1034_p6 = pneg %p1033_p4 }
  0x31   : > { %p1039_p3 = pnand %p1037_p10, %p1034_p6 }
  0x33   : > { %1042 = shalt.err (!%p1039_p3)
}
  0x34   : > { %s1043_s7 = scalar_lea.vmem %s1284_s10, 2048  ;;  %p1051_p12 = scmp.lt.s32.totalorder %s1284_s10, %s1284_s10 }
  0x35   : > { %p1044_p5 = scmp.ne.s32.totalorder %s1284_s10, %s1043_s7  ;;  %p1052_p0 = scmp.lt.s32.totalorder %s1043_s7, %s1043_s7 }
  0x37   : > { %p1046_p7 = pnand %p1044_p5, %p1004_p13  ;;  %p1053_p1 = por %p1052_p0, %p1051_p12 }
  0x39   : > { %p1047_p9 = pneg %p1046_p7 }
  0x3b   : > { %p1054_p4 = pnand %p1053_p1, %p1047_p9 }
  0x3d   : > { %1057 = shalt.err (!%p1054_p4)
}
  0x3e   : > { %s1180_s25 = smov 64   ;;  %s1181_s6 = smov 4  }
  0x3f   : > { %888 = dma.hbm_to_vmem [thread:$0]  (!%p1280_p11), %s1478_s3, 2048, %s1284_s10, [#allocation7], %s1180_s25, %s1180_s25, %s1181_s6  }
  0x40   : > { %s34_s12 = sadd.s32 1, %s1170_s22  ;;  %s41_s13 = sadd.s32 1, %s1162_s20 }
  0x41   : > { %p36_p13 = scmp.ge.s32.totalorder %s34_s12, 2  ;;  %p48_p6 = scmp.ne.s32.totalorder %s1162_s20, %s1158_s19 }
  0x42   : > { %p49_p10 = scmp.eq.s32.totalorder %s1174_s23, 0  ;;  %p899_p3 = scmp.lt.s32.totalorder %s1174_s23, 2 }
  0x43   : > { %s1504_s12 = smov (%p36_p13, %s34_s12), 0  ;;  %p1348_p7 = por %p1253_p2, %p48_p6 }
  0x44   : > { %p50_p5 = por %p49_p10, %p48_p6  ;;  %s38_s8 = ssub.s32 %s1170_s22, %s1504_s12 }
  0x45   : > { %s1491_s14 = scalar_select %p1348_p7, 1, 0 }
  0x46   : > { %s246_s15 = sand.u32 1, %s1162_s20   ;;  %p39_p9 = scmp.eq.s32.totalorder %s38_s8, 0 }
  0x47   : > { %s804_s10 = sshll.u32 %s246_s15, 2  ;;  %s805_s16 = sshll.u32 %s1170_s22, 6 }
  0x48   : > { %s1357_s17 = scalar_select %p39_p9, %s1162_s20, %s41_s13  }
  0x49   : > { %s1362_s25 = scalar_lea.hbm %s1475_s0, %s805_s16  ;;  %s250_s27 = scalar_lea.vmem [#allocation3], %s804_s10 }
  0x4a   : > { %s257_s6 = sshll.u32 %s250_s27, 4  ;;  %p1366_p2 = pnand %p899_p3, %p50_p5  ;;  %s1370_s6 = int_to_ptr.vmem [resolvable:$true] %s257_s6 }
  0x4b   : > { %s247_s11 = scalar_lea.sflag [#allocation4], %s246_s15  ;;  %s1058_s13 = scalar_lea.hbm %s1362_s25, 64 }
  0x4c   : > { %p1059_p11 = scmp.ne.s32.totalorder %s1362_s25, %s1058_s13  ;;  %p1060_p12 = pneg %p1366_p2 }
  0x4d   : > { %s1063_s16 = scalar_lea.hbm %s1475_s0, 128  ;;  %p1064_p4 = scmp.lt.u32.totalorder %s1362_s25, %s1475_s0 }
  0x4e   : > { %p1061_p0 = pnand %p1060_p12, %p1059_p11  ;;  %p1065_p13 = scmp.lt.u32.totalorder %s1063_s16, %s1058_s13 }
  0x4f   : > { %p1067_p10 = scmp.lt.u32.totalorder %s1058_s13, %s1362_s25 }
  0x50   : > { %p1062_p1 = pneg %p1061_p0  ;;  %p1066_p6 = por %p1065_p13, %p1064_p4 }
  0x52   : > { %p1068_p3 = por %p1067_p10, %p1066_p6 }
  0x54   : > { %p1069_p5 = pnand %p1068_p3, %p1062_p1 }
  0x56   : > { %1072 = shalt.err (!%p1069_p5)
}
  0x57   : > { %s1073_s15 = scalar_lea.vmem %s1370_s6, 64  ;;  %s1182_s27 = smov [#allocation3]  }
  0x58   : > { %p1074_p9 = scmp.ne.s32.totalorder %s1370_s6, %s1073_s15  ;;  %s1078_s8 = sshll.u32 %s1182_s27, 4  ;;  %s1079_s8 = int_to_ptr.vmem [resolvable:$false] %s1078_s8 }
  0x59   : > { %s1080_s10 = scalar_lea.vmem %s1079_s8, 128  ;;  %p1081_p7 = scmp.lt.s32.totalorder %s1370_s6, %s1079_s8 }
  0x5a   : > { %p1076_p11 = pnand %p1074_p9, %p1060_p12  ;;  %p1082_p4 = scmp.lt.s32.totalorder %s1080_s10, %s1073_s15 }
  0x5c   : > { %p1077_p0 = pneg %p1076_p11  ;;  %p1083_p13 = por %p1082_p4, %p1081_p7 }
  0x5e   : > { %p1084_p6 = pnand %p1083_p13, %p1077_p0 }
  0x60   : > { %1087 = shalt.err (!%p1084_p6)
}
  0x61   : > { %892 = dma.hbm_to_vmem [thread:$0]  (!%p1366_p2), %s1362_s25, 64, %s1370_s6, %s247_s11  }
  0x62   : > { %266 = sbr.rel (%p1269_p8) target bundleno = 608 (0x260), region = 40  ;;  %s1400_s13 = sand.u32 (!%p1269_p8), 1, %s1158_s19  }
  0x63   : > { %s807_s16 = sshll.u32 (!%p1269_p8), %s1400_s13, 2  ;;  %s269_s24 = scalar_lea.sflag (!%p1269_p8), [#allocation4], %s1400_s13 }
  0x64   : > { %s1404_s7 = scalar_lea.vmem (!%p1269_p8), [#allocation3], %s807_s16  ;;  %p1493_p7 = scmp.ne.s32.totalorder (!%p1269_p8), %s1487_s28, 0 }
  0x69   : > { %1141 = dma.done.wait (%p1493_p7), %s269_s24, 64  }
  0x6a   : > { %1143 = vsyncadd (%p1493_p7), %s269_s24, 4294967232  ;;  %p1494_p2 = scmp.ne.s32.totalorder %s1485_s26, 0 }
  0x6c   : > { %1145 = dma.done.wait (%p1494_p2), [#allocation7], 4096  }
  0x6d   : > { %1147 = vsyncadd (%p1494_p2), [#allocation7], 4294963200  ;;  %v1183_v0 = vmov 0   ;;  %v958_v1 = vld [vmem:[#allocation6 + $0x4] ss:$8 sps:$4 sm:$0xff]   ;;  %v986_v22 = vld [vmem:[#allocation8 + $0x50] sm:$0xff]   ;;  %v343_v34 = vlaneseq }
  0x6e   : > { %465 = vmatprep.mubr.bf16.mxu0 %v1183_v0  ;;  %v960_v2 = vld [vmem:[#allocation6] ss:$8 sps:$4 sm:$0xff]   ;;  %433 = vmatprep.subr.bf16.mxu0 %v958_v1  ;;  %v961_v3 = vld [vmem:[#allocation6 + $0x14] ss:$8 sps:$4 sm:$0xff]   ;;  %v963_v4 = vld [vmem:[#allocation6 + $0x10] ss:$8 sps:$4 sm:$0xff]  }
  0x6f   : > { %434 = vmatpush1.bf16.msra.mxu0 %v960_v2  ;;  %v964_v5 = vld [vmem:[#allocation6 + $0x24] ss:$8 sps:$4 sm:$0xff]   ;;  %v966_v6 = vld [vmem:[#allocation6 + $0x20] ss:$8 sps:$4 sm:$0xff]   ;;  %v967_v7 = vld [vmem:[#allocation6 + $0x34] ss:$8 sps:$4 sm:$0xff]  }
  0x70   : > { %435 = vmatprep.subr.bf16.mxu0 %v961_v3  ;;  %v969_v8 = vld [vmem:[#allocation6 + $0x30] ss:$8 sps:$4 sm:$0xff]   ;;  %v970_v9 = vld [vmem:[#allocation6 + $0x44] ss:$8 sps:$4 sm:$0xff]   ;;  %v972_v12 = vld [vmem:[#allocation6 + $0x40] ss:$8 sps:$4 sm:$0xff]  }
  0x71   : > { %v982_v10 = vld [vmem:[#allocation8 + $0x40] sm:$0xff]   ;;  %v984_v13 = vld [vmem:[#allocation8 + $0x48] sm:$0xff]   ;;  %v973_v15 = vld [vmem:[#allocation6 + $0x54] ss:$8 sps:$4 sm:$0xff]   ;;  %v344_v35 = vshrl.u32 %v343_v34, 7  ;;  %s810_s30 = sshll.u32 %s1400_s13, 3 }
  0x72   : > { %v983_v11 = vld [vmem:[#allocation8] sm:$0xff]   ;;  %848 = vmatprep.subr.bf16.mxu1 %v982_v10  ;;  %v985_v14 = vld [vmem:[#allocation8 + $0x8] sm:$0xff]   ;;  %v975_v16 = vld [vmem:[#allocation6 + $0x50] ss:$8 sps:$4 sm:$0xff]   ;;  %s845_s9 = sshll.u32 %s1166_s21, 7  ;;  %s310_s11 = scalar_lea.vmem [#allocation9], %s810_s30 }
  0x73   : > { %436 = vmatpush1.bf16.msra.mxu0 %v963_v4  ;;  %849 = vmatpush3.bf16.msra.mxu1 %v983_v11  ;;  %v976_v17 = vld [vmem:[#allocation6 + $0x64] ss:$8 sps:$4 sm:$0xff]   ;;  %v978_v18 = vld [vmem:[#allocation6 + $0x60] ss:$8 sps:$4 sm:$0xff]   ;;  %v979_v19 = vld [vmem:[#allocation6 + $0x74] ss:$8 sps:$4 sm:$0xff]   ;;  %s1426_s10 = scalar_lea.hbm %s1480_s5, %s845_s9 }
  0x74   : > { %437 = vmatprep.subr.bf16.mxu0 %v964_v5  ;;  %850 = vmatprep.subr.bf16.mxu1 %v984_v13  ;;  %v981_v20 = vld [vmem:[#allocation6 + $0x70] ss:$8 sps:$4 sm:$0xff]   ;;  %v990_v26 = vld [vmem:[#allocation8 + $0x60] sm:$0xff]   ;;  %v992_v28 = vld [vmem:[#allocation8 + $0x68] sm:$0xff]   ;;  %v345_v36 = vsub.s32 0, %v344_v35  ;;  %v349_v38 = vsub.s32 1, %v344_v35 }
  0x75   : > { %v324_v21 = vld [vmem:[%s1404_s7] sm:$0xf]  ;;  %v987_v23 = vld [vmem:[#allocation8 + $0x10] sm:$0xff]   ;;  %v991_v27 = vld [vmem:[#allocation8 + $0x20] sm:$0xff]   ;;  %s684_s15 = sshll.u32 %s310_s11, 4  ;;  %s671_s16 = scalar_lea.sflag [#allocation5], %s1400_s13  ;;  %s1428_s15 = int_to_ptr.vmem [resolvable:$true] %s684_s15 }
  0x76   : > { %v988_v24 = vld [vmem:[#allocation8 + $0x58] sm:$0xff]   ;;  %v993_v29 = vld [vmem:[#allocation8 + $0x28] sm:$0xff]   ;;  %v994_v30 = vld [vmem:[#allocation8 + $0x70] sm:$0xff]   ;;  %s1088_s24 = scalar_lea.vmem %s1428_s15, 128  ;;  %p1495_p12 = scmp.ne.s32.totalorder %s1491_s14, 0 }
  0x77   : > { %438 = vmatpush1.bf16.msra.mxu0 %v966_v6  ;;  %851 = vmatpush3.bf16.msra.mxu1 %v985_v14  ;;  %v989_v25 = vld [vmem:[#allocation8 + $0x18] sm:$0xff]   ;;  %v995_v31 = vld [vmem:[#allocation8 + $0x30] sm:$0xff]   ;;  %p1089_p8 = scmp.ne.s32.totalorder %s1428_s15, %s1088_s24  ;;  %s1184_s21 = smov [#allocation9]  }
  0x78   : > { %439 = vmatprep.subr.bf16.mxu0 %v967_v7  ;;  %852 = vmatprep.subr.bf16.mxu1 %v986_v22  ;;  %v996_v32 = vld [vmem:[#allocation8 + $0x78] sm:$0xff]   ;;  %s1092_s7 = sshll.u32 %s1184_s21, 4  ;;  %s1093_s7 = int_to_ptr.vmem [resolvable:$false] %s1092_s7 }
  0x79   : > { %v997_v33 = vld [vmem:[#allocation8 + $0x38] sm:$0xff]   ;;  %p1090_p1 = pnand %p1089_p8, %p1495_p12  ;;  %s1094_s26 = scalar_lea.vmem %s1093_s7, 256 }
  0x7a   : > { %v341_v37 = vld [vmem:[%s1477_s2] sm:$0x3]  ;;  %p1095_p3 = scmp.lt.s32.totalorder %s1428_s15, %s1093_s7  ;;  %p1096_p5 = scmp.lt.s32.totalorder %s1094_s26, %s1088_s24 }
  0x7b   : > { %440 = vmatpush1.bf16.msra.mxu0 %v969_v8  ;;  %853 = vmatpush3.bf16.msra.mxu1 %v987_v23  ;;  %v346_v39 = vrot.slane %v341_v37, %v345_v36  ;;  %v350_v40 = vrot.slane %v341_v37, %v349_v38  ;;  %v843_v61 = vld [vmem:[%s1479_s4] ss:$0 sm:$0xff]  ;;  %p1091_p10 = pneg %p1090_p1 }
  0x7c   : > { %441 = vmatprep.subr.bf16.mxu0 %v970_v9  ;;  %854 = vmatprep.subr.bf16.mxu1 %v988_v24  ;;  %p1097_p9 = por %p1096_p5, %p1095_p3 }
  0x7e   : > { %p1098_p11 = pnand %p1097_p9, %p1091_p10 }
  0x7f   : > { %442 = vmatpush1.bf16.msra.mxu0 %v972_v12  ;;  %855 = vmatpush3.bf16.msra.mxu1 %v989_v25 }
  0x80   : > { %443 = vmatprep.subr.bf16.mxu0 %v973_v15  ;;  %856 = vmatprep.subr.bf16.mxu1 %v990_v26 }
  0x83   : > { %444 = vmatpush1.bf16.msra.mxu0 %v975_v16  ;;  %857 = vmatpush3.bf16.msra.mxu1 %v991_v27 }
  0x84   : > { %445 = vmatprep.subr.bf16.mxu0 %v976_v17  ;;  %858 = vmatprep.subr.bf16.mxu1 %v992_v28 }
  0x87   : > { %446 = vmatpush1.bf16.msra.mxu0 %v978_v18  ;;  %859 = vmatpush3.bf16.msra.mxu1 %v993_v29 }
  0x88   : > { %447 = vmatprep.subr.bf16.mxu0 %v979_v19  ;;  %860 = vmatprep.subr.bf16.mxu1 %v994_v30 }
  0x8b   : > { %448 = vmatpush1.bf16.msra.mxu0 %v981_v20  ;;  %861 = vmatpush3.bf16.msra.mxu1 %v995_v31 }
  0x8c   : > { %862 = vmatprep.subr.bf16.mxu1 %v996_v32 }
  0x8e   : > { %466 = vmatmul.mubr.bf16.vlgmr.msra.gmra.mrb[0].mxu0 %v324_v21 }
  0x8f   : > { %863 = vmatpush3.bf16.msra.mxu1 %v997_v33 }
 0x161   : > { %v467_v41 = vpop.f32.mrb[0].mxu0 }
 0x162   : > { %v468_v42 = vadd.f32 %v467_v41, %v346_v39  ;;  %v469_v43 = vpop.f32.mrb[1].mxu0 }
 0x163   : > { %v470_v44 = vadd.f32 %v469_v43, %v350_v40  ;;  %v471_v45 = vpop.f32.mrb[2].mxu0 }
 0x164   : > { %v476_v46 = vmul.f32 0.70710677, %v468_v42  ;;  %v472_v47 = vpop.f32.mrb[3].mxu0  ;;  %v474_v51 = vmul.f32 0.5, %v468_v42 }
 0x165   : > { %v477_v48 = vmul.f32 0.70710677, %v470_v44  ;;  %v475_v53 = vmul.f32 0.5, %v470_v44 }
 0x166   : > { %998 = verf.f32 %v476_v46 }
 0x167   : > { %1000 = verf.f32 %v477_v48 }
 0x170   : > { %v999_v49 = vpop.eup %998 }
 0x171   : > { %v1001_v50 = vpop.eup %1000  ;;  %v480_v52 = vadd.f32 1.0, %v999_v49 }
 0x172   : > { %v481_v54 = vadd.f32 1.0, %v1001_v50 }
 0x173   : > { %v482_v55 = vmul.f32 %v480_v52, %v474_v51 }
 0x174   : > { %v483_v56 = vmul.f32 %v481_v54, %v475_v53 }
 0x175   : > { %v485_v58 = vpack.c.bf16 %v482_v55, %v482_v55 }
 0x176   : > { %v486_v57 = vpack.c.bf16 %v483_v56, %v483_v56 }
 0x178   : > { %647 = vmatprep.mubr.bf16.mxu1 %v486_v57 }
 0x179   : > { %648 = vmatmul.mubr.bf16.vlgmr.msra.gmra.mrb[0].mxu1 %v485_v58 }
 0x24c   : > { %v864_v59 = vpop.f32.mrb[0].mxu1 }
 0x24d   : > { %v865_v60 = vpop.f32.mrb[1].mxu1 }
 0x24e   : > { %v866_v62 = vadd.f32 %v865_v60, %v864_v59  ;;  %v867_v63 = vpop.f32.mrb[2].mxu1 }
 0x24f   : > { %v868_v0 = vpop.f32.mrb[3].mxu1 }
 0x250   : > { %v668_v1 = vadd.f32 %v866_v62, %v843_v61 }
 0x252   : > { %669 = vst [vmem:[%s310_s11] sm:$0xff] %v668_v1 }
 0x253   : > { %1101 = shalt.err (!%p1098_p11)
}
 0x254   : > { %s1102_s13 = scalar_lea.hbm %s1426_s10, 128  ;;  %s1106_s25 = scalar_lea.hbm %s1480_s5, 256 }
 0x255   : > { %p1103_p0 = scmp.ne.s32.totalorder %s1426_s10, %s1102_s13  ;;  %p1107_p6 = scmp.lt.u32.totalorder %s1426_s10, %s1480_s5 }
 0x256   : > { %p1108_p7 = scmp.lt.u32.totalorder %s1106_s25, %s1102_s13  ;;  %p1110_p8 = scmp.lt.u32.totalorder %s1102_s13, %s1426_s10 }
 0x257   : > { %p1104_p4 = pnand %p1103_p0, %p1495_p12 }
 0x258   : > { %p1109_p2 = por %p1108_p7, %p1107_p6 }
 0x259   : > { %p1105_p13 = pneg %p1104_p4 }
 0x25a   : > { %p1111_p1 = por %p1110_p8, %p1109_p2 }
 0x25c   : > { %p1112_p10 = pnand %p1111_p1, %p1105_p13 }
 0x25e   : > { %1115 = shalt.err (!%p1112_p10)
}
 0x25f   : > { %880 = dma.vmem_to_hbm [thread:$0]  (%p1495_p12), %s1428_s15, 128, %s1426_s10, %s671_s16  }
 0x260 PF: > { %s696_s11 = sand.u32 1, %s1154_s18   ;;  %p1496_p3 = scmp.ne.s32.totalorder %s1488_s29, 0 }
 0x261   : > { %p1497_p5 = scmp.ge.s32.totalorder %s1174_s23, 2  ;;  %s697_s27 = scalar_lea.sflag [#allocation5], %s696_s11 }
 0x263   : > { %p894_p9 = pnand %p1497_p5, %p1496_p3 }
 0x265   : > { %1149 = dma.done.wait (!%p894_p9), %s697_s27, 128  }
 0x266   : > { %1151 = vsyncadd (!%p894_p9), %s697_s27, 4294967168  ;;  %s22_s23 = sadd.s32 1, %s1174_s23   ;;  %s1498_s18 = smov %s1158_s19 }
 0x267   : > { %p19_p11 = scmp.ge.s32.totalorder %s22_s23, 4   ;;  %s1499_s19 = smov %s1162_s20 }
 0x268   : > { %s1500_s20 = smov %s1357_s17  ;;  %s1501_s21 = smov %s1170_s22 }
 0x269   : > { %s1502_s22 = smov %s1504_s12  ;;  %21 = sbr.rel (!%p19_p11) target bundleno = 7 (0x7), region = 106 }
 0x270   :  { %702 = vsyncpa [#allocation4], 1 }
 0x271   :  { %704 = vsyncpa [#allocation4 + $0x1], 1 }
 0x272   :  { %705 = vsyncpa [#allocation7], 1 }
 0x273   :  { %706 = vsyncpa [#allocation5], 1 }
 0x274   :  { %708 = vsyncpa [#allocation5 + $0x1], 1 }

</bundles_post_ra>
